<compile_context>
chip_gen: v7x
topology: tpu7x:2x2x1
jax: 0.10.0
libtpu: 0.0.40
codegen_flags: <defaults>
</compile_context>

<pallas_src>
import jax
import jax.numpy as jnp
from jax.experimental import pallas as pl
from jax.experimental.pallas import tpu as pltpu

EPS = 1e-9


def _tps_l_kernel(xt_ref, l_ref):
    """Fused TPS system-matrix kernel.

    xt_ref: (Bn, 2, k) VMEM tile — transposed points, coordinates lane-dense.
    l_ref : (Bn, k+3, k+3) VMEM output tile — the full system matrix
                 [ K    P ]
             L = [ P^T  0 ],   K[i, j] = d2 * log(d2 + eps),  P = [1, x, y].
    """
    Bn, _, k = xt_ref.shape

    xt = xt_ref[...]                        # (Bn, 2, k)
    xs = xt[:, 0, :]                        # (Bn, k)  x coords, lane-dense
    ys = xt[:, 1, :]                        # (Bn, k)  y coords, lane-dense

    # Coordinate-split pairwise squared distances: stays in lane-dense
    # (Bn, k, k) vregs; no (k, k, 2) intermediate, no cross-lane reduction.
    dx = xs[:, :, None] - xs[:, None, :]    # (Bn, k, k)
    dy = ys[:, :, None] - ys[:, None, :]    # (Bn, k, k)
    d2 = dx * dx + dy * dy                  # >= 0, diagonal exactly 0
    K = d2 * jnp.log(d2 + EPS)              # diag: 0 * log(eps) = 0 (matches ref)

    # Assemble the whole block in registers, store once (no zero-fill pass,
    # no narrow masked column/row stores).
    ones_col = jnp.ones((Bn, k, 1), jnp.float32)
    top = jnp.concatenate(                  # (Bn, k, k+3) = [K | 1 | x | y]
        [K, ones_col, xs[:, :, None], ys[:, :, None]], axis=-1)
    pt = jnp.concatenate(                   # (Bn, 3, k) = P^T
        [jnp.ones((Bn, 1, k), jnp.float32), xs[:, None, :], ys[:, None, :]],
        axis=1)
    bottom = jnp.concatenate(               # (Bn, 3, k+3) = [P^T | 0]  (zero corner)
        [pt, jnp.zeros((Bn, 3, 3), jnp.float32)], axis=-1)
    l_ref[...] = jnp.concatenate([top, bottom], axis=1)   # single full-tile store


def _pick_bn(N, k, budget_bytes=6 << 20):
    """Batch elements per grid step.

    Budgets double-buffered input/output blocks PLUS the live (Bn, k, k)
    f32 intermediates (dx/dy/d2/K/concat) against ~6 MiB so the kernel fits
    v5e's 16 MiB scoped-VMEM default and v7x's 64 MiB physical VMEM without
    raising vmem_limit_bytes, while amortizing the ~0.35 us per-step overhead.
    Keeps >= 2 grid steps when N >= 2 so v7x can use both TensorCores.
    """
    out_b = (k + 3) * (k + 3) * 4
    in_b = 2 * k * 4
    tmp_b = 5 * k * k * 4
    per = 2 * out_b + 2 * in_b + tmp_b      # double-buffered I/O + live temps
    cap = max(1, budget_bytes // per)
    if N >= 2:
        bn = min(cap, -(-N // 2))           # ceil(N/2) -> at least 2 grid steps
    else:
        bn = 1
    return max(1, min(bn, N))


def tps_l_pallas(X):
    """X: (N, k, 2) float32 -> L: (N, k+3, k+3) float32 via one Pallas kernel."""
    N, k, _ = X.shape
    # One small transpose in the wrapper so the kernel sees lane-dense coords.
    Xt = jnp.transpose(X, (0, 2, 1))                     # (N, 2, k)
    Bn = _pick_bn(N, k)
    grid = (pl.cdiv(N, Bn),)                             # ragged last block OK:
    # out-of-bounds writes of the final partial block are dropped by Pallas.
    cost = pl.CostEstimate(
        flops=6 * N * k * k,
        transcendentals=N * k * k,
        bytes_accessed=N * ((k + 3) * (k + 3) + 2 * k) * 4,
    )
    # TODO(synk): for N == 1 on v7x (2 TensorCores), add a second parallel
    #   grid axis tiling the k rows of K (tm multiple of 8) and emit the P^T
    #   rows / zero corner only from the last row-tile via pl.when.
    # TODO(synk): for small k (k+3 << 128) a lane-dense output layout
    #   ((k+3, k+3, Bn) with Bn a multiple of 128, transposed in the wrapper)
    #   would avoid masked partial stores; not done here to keep the solve's
    #   input layout unchanged.
    return pl.pallas_call(
        _tps_l_kernel,
        grid=grid,
        in_specs=[pl.BlockSpec((Bn, 2, k), lambda n: (n, 0, 0))],
        out_specs=pl.BlockSpec((Bn, k + 3, k + 3), lambda n: (n, 0, 0)),
        out_shape=jax.ShapeDtypeStruct((N, k + 3, k + 3), jnp.float32),
        compiler_params=pltpu.CompilerParams(
            dimension_semantics=("parallel",)),
        cost_estimate=cost,
    )(Xt)


def tps_coeffs(X, Y):
    """JAX/Pallas equivalent of TPS_coeffs.forward.

    X : (N, k, 2) float32
    Y : (1, k, 2) float32
    Returns
      W : (N, k, 2)  non-affine part of the spline
      A : (N, 3, 2)  affine part of the spline
    """
    X = jnp.asarray(X, jnp.float32)
    Y = jnp.asarray(Y, jnp.float32)
    N, k = X.shape[:2]

    # Hot path fully in Pallas: K + P + P^T assembled directly into L.
    L = tps_l_pallas(X)                                          # (N, k+3, k+3)

    Z = jnp.zeros((1, k + 3, 2), jnp.float32).at[:, :k, :].set(Y)  # (1, k+3, 2)

    # TODO(synk): batched LU solve with partial pivoting has no clean Pallas
    # equivalent (K has a zero diagonal, so pivoting is required); use
    # jnp.linalg.solve for this step.
    Q = jnp.linalg.solve(L, jnp.broadcast_to(Z, (N, k + 3, 2)))

    return Q[:, :k], Q[:, k:]


def _tps_coeffs_ref(X, Y):
    """Pure-JAX reference mirroring the PyTorch module exactly."""
    X = jnp.asarray(X, jnp.float32)
    Y = jnp.asarray(Y, jnp.float32)
    N, k = X.shape[:2]
    D2 = jnp.sum((X[:, :, None, :] - X[:, None, :, :]) ** 2, axis=-1)
    K = D2 * jnp.log(D2 + EPS)
    P = jnp.concatenate([jnp.ones((N, k, 1), jnp.float32), X], axis=-1)
    Z = jnp.zeros((1, k + 3, 2), jnp.float32).at[:, :k, :].set(Y)
    L = jnp.zeros((N, k + 3, k + 3), jnp.float32)
    L = L.at[:, :k, :k].set(K)
    L = L.at[:, :k, k:].set(P)
    L = L.at[:, k:, :k].set(jnp.transpose(P, (0, 2, 1)))
    Q = jnp.linalg.solve(L, jnp.broadcast_to(Z, (N, k + 3, 2)))
    return Q[:, :k], Q[:, k:]


if __name__ == "__main__":
    key = jax.random.PRNGKey(0)
    kx, ky = jax.random.split(key)

    N, k = 2, 8
    X = jax.random.normal(kx, (N, k, 2), dtype=jnp.float32)        # projected points
    Y = jax.random.normal(ky, (1, k, 2), dtype=jnp.float32)        # UV map

    W, A = jax.jit(tps_coeffs)(X, Y)
    W = jax.block_until_ready(W)
    A = jax.block_until_ready(A)

    W_ref, A_ref = _tps_coeffs_ref(X, Y)
    assert W.shape == (N, k, 2) and A.shape == (N, 3, 2)
    assert jnp.allclose(W, W_ref, atol=1e-4, rtol=1e-4)
    assert jnp.allclose(A, A_ref, atol=1e-4, rtol=1e-4)

    print("KERNEL_OK")
</pallas_src>

<mosaic_0001>
module attributes {stable_mosaic.version = 11 : i64} {
  func.func @_tps_l_kernel(%arg0: i32, %arg1: memref<1x2x8xf32, #tpu.memory_space<vmem>>, %arg2: memref<1x11x11xf32, #tpu.memory_space<vmem>>) attributes {dimension_semantics = [#tpu.dimension_semantics<parallel>], iteration_bounds = array<i64: 2>, scalar_prefetch = 0 : i64, scratch_operands = 0 : i64, tpu.core_type = #tpu.core_type<tc>, window_params = [{transform_indices = @transform_0, window_bounds = array<i64: 1, 2, 8>}, {transform_indices = @transform_1, window_bounds = array<i64: 1, 11, 11>}]} {
    %c0 = arith.constant 0 : index
    %c0_0 = arith.constant 0 : index
    %c0_1 = arith.constant 0 : index
    %0 = vector.load %arg1[%c0, %c0_0, %c0_1] : memref<1x2x8xf32, #tpu.memory_space<vmem>>, vector<1x2x8xf32>
    %1 = vector.extract_strided_slice %0 {offsets = [0, 0, 0], sizes = [1, 1, 8], strides = [1, 1, 1]} : vector<1x2x8xf32> to vector<1x1x8xf32>
    %2 = vector.shape_cast %1 : vector<1x1x8xf32> to vector<1x8xf32>
    %3 = vector.extract_strided_slice %0 {offsets = [0, 1, 0], sizes = [1, 1, 8], strides = [1, 1, 1]} : vector<1x2x8xf32> to vector<1x1x8xf32>
    %4 = vector.shape_cast %3 : vector<1x1x8xf32> to vector<1x8xf32>
    %5 = vector.shape_cast %2 : vector<1x8xf32> to vector<1x8x1xf32>
    %6 = vector.shape_cast %2 : vector<1x8xf32> to vector<1x1x8xf32>
    %7 = vector.broadcast %5 : vector<1x8x1xf32> to vector<1x8x8xf32>
    %8 = vector.broadcast %6 : vector<1x1x8xf32> to vector<1x8x8xf32>
    %9 = arith.subf %7, %8 : vector<1x8x8xf32>
    %10 = vector.shape_cast %4 : vector<1x8xf32> to vector<1x8x1xf32>
    %11 = vector.shape_cast %4 : vector<1x8xf32> to vector<1x1x8xf32>
    %12 = vector.broadcast %10 : vector<1x8x1xf32> to vector<1x8x8xf32>
    %13 = vector.broadcast %11 : vector<1x1x8xf32> to vector<1x8x8xf32>
    %14 = arith.subf %12, %13 : vector<1x8x8xf32>
    %15 = arith.mulf %9, %9 : vector<1x8x8xf32>
    %16 = arith.mulf %14, %14 : vector<1x8x8xf32>
    %17 = arith.addf %15, %16 : vector<1x8x8xf32>
    %cst = arith.constant 9.99999971E-10 : f32
    %18 = vector.broadcast %cst : f32 to vector<1x8x8xf32>
    %19 = arith.addf %17, %18 : vector<1x8x8xf32>
    %20 = math.log %19 : vector<1x8x8xf32>
    %21 = arith.mulf %17, %20 : vector<1x8x8xf32>
    %cst_2 = arith.constant 1.000000e+00 : f32
    %22 = vector.broadcast %cst_2 : f32 to vector<1x8x1xf32>
    %23 = vector.shape_cast %2 : vector<1x8xf32> to vector<1x8x1xf32>
    %24 = vector.shape_cast %4 : vector<1x8xf32> to vector<1x8x1xf32>
    %25 = tpu.concatenate %21, %22, %23, %24 in 2 : vector<1x8x8xf32>, vector<1x8x1xf32>, vector<1x8x1xf32>, vector<1x8x1xf32> -> vector<1x8x11xf32>
    %cst_3 = arith.constant 1.000000e+00 : f32
    %26 = vector.broadcast %cst_3 : f32 to vector<1x1x8xf32>
    %27 = vector.shape_cast %2 : vector<1x8xf32> to vector<1x1x8xf32>
    %28 = vector.shape_cast %4 : vector<1x8xf32> to vector<1x1x8xf32>
    %29 = tpu.concatenate %26, %27, %28 in 1 : vector<1x1x8xf32>, vector<1x1x8xf32>, vector<1x1x8xf32> -> vector<1x3x8xf32>
    %cst_4 = arith.constant 0.000000e+00 : f32
    %30 = vector.broadcast %cst_4 : f32 to vector<1x3x3xf32>
    %31 = tpu.concatenate %29, %30 in 2 : vector<1x3x8xf32>, vector<1x3x3xf32> -> vector<1x3x11xf32>
    %32 = tpu.concatenate %25, %31 in 1 : vector<1x8x11xf32>, vector<1x3x11xf32> -> vector<1x11x11xf32>
    %c0_5 = arith.constant 0 : index
    %c0_6 = arith.constant 0 : index
    %c0_7 = arith.constant 0 : index
    %33 = vector.load %arg2[%c0_5, %c0_6, %c0_7] : memref<1x11x11xf32, #tpu.memory_space<vmem>>, vector<1x11x11xf32>
    tpu.vector_store %arg2[%c0_5, %c0_6, %c0_7], %32 {strides = array<i32>} : memref<1x11x11xf32, #tpu.memory_space<vmem>>, vector<1x11x11xf32>,
    return
  }
  func.func @transform_0(%arg0: i32) -> (i32, i32, i32) {
    %c0_i32 = arith.constant 0 : i32
    %c0_i32_0 = arith.constant 0 : i32
    %c0_i32_1 = arith.constant 0 : i32
    return %arg0, %c0_i32, %c0_i32_0 : i32, i32, i32
  }
  func.func @transform_1(%arg0: i32) -> (i32, i32, i32) {
    %c0_i32 = arith.constant 0 : i32
    %c0_i32_0 = arith.constant 0 : i32
    %c0_i32_1 = arith.constant 0 : i32
    return %arg0, %c0_i32, %c0_i32_0 : i32, i32, i32
  }
}

</mosaic_0001>

<bundles_post_ra>
// kernel: custom-call.8
= control target key start
LH: loop header
LB: loop body
LE: loop exit
PB: predicated region body
PF: predicated region fallthrough
CT: control target
= control target key end

     0   :  { %5 = vsyncpa [#allocation4], 0  ;;  %s964_s0 = inlined_call_operand.vmem [shape: f32[2,11,11], index: 0, kind: input, shape index: {}]   ;;  %s965_s1 = inlined_call_operand.vmem [shape: f32[2,11,11], index: 1, kind: output, shape index: {0}]   ;;  %s966_s2 = inlined_call_operand.hbm [shape: s32[2,11], index: 2, kind: output, shape index: {1}]   ;;  %s967_s3 = inlined_call_operand.vmem [shape: s32[2,11], index: 3, kind: output, shape index: {2}]  }
   0x1   :  { %7 = vsyncpa [#allocation4 + $0x1], 0  ;;  %s755_s12 = smov 0   ;;  %s757_s13 = smov 0  }
   0x2   :  { %s759_s14 = smov 0   ;;  %s761_s15 = smov 0  }
   0x3 LB: > { %s776_s16 = sadd.s32 4294967295, %s723_s15   ;;  %s565_s17 = sadd.s32 4294967294, %s723_s15   ;;  %s723_s15 = sphi %s761_s15, %s975_s15   ;;  %s719_s14 = sphi %s759_s14, %s974_s14   ;;  %s715_s13 = sphi %s757_s13, %s973_s13   ;;  %s711_s12 = sphi %s755_s12, %s972_s12  }
   0x4   : > { %s780_s18 = sadd.s32 1, %s723_s15   ;;  %s17_s19 = sshrl.u32 %s723_s15, 3 }
   0x5   : > { %s18_s20 = sshrl.u32 %s780_s18, 3  ;;  %s22_s21 = sadd.s32 1, %s719_s14 }
   0x6   : > { %s19_s22 = ssub.s32 %s17_s19, %s18_s20  ;;  %p32_p0 = scmp.ne.s32.totalorder %s719_s14, %s715_s13 }
   0x7   : > { %p20_p1 = scmp.eq.s32.totalorder %s19_s22, 0  ;;  %p33_p2 = scmp.eq.s32.totalorder %s776_s16, 1 }
   0x8   : > { %p38_p3 = scmp.ne.s32.totalorder %s715_s13, %s711_s12  ;;  %p39_p4 = scmp.eq.s32.totalorder %s565_s17, 1 }
   0x9   : > { %s791_s23 = scalar_select %p20_p1, %s719_s14, %s22_s21  }
   0xa   : > { %p793_p5 = por %p33_p2, %p32_p0  ;;  %p797_p6 = por %p39_p4, %p38_p3 }
   0xb   : > { %p567_p7 = scmp.ge.s32.totalorder %s723_s15, 2 }
   0xc   : > { %s85_s26 = sand.u32 (!%p567_p7), 1, %s723_s15   ;;  %s569_s27 = sshll.u32 (!%p567_p7), %s723_s15, 4 }
   0xd   : > { %83 = sbr.rel (%p567_p7) target bundleno = 20 (0x14), region = 16  ;;  %s568_s28 = sshll.u32 (!%p567_p7), %s85_s26, 4 }
   0xe   : > { %s89_s4 = scalar_lea.vmem (!%p567_p7), %s964_s0, %s569_s27  ;;  %s87_s5 = scalar_lea.vmem (!%p567_p7), [#allocation0], %s568_s28 }
   0xf   : > { %v102_v0 = vld [vmem:[%s89_s4] sm:$0xff] (!%p567_p7)  ;;  %v104_v1 = vld [vmem:[%s89_s4 + $0x8] sm:$0xff] (!%p567_p7) }
  0x10   : > { %103 = vst [vmem:[%s87_s5] sm:$0xff] (!%p567_p7), %v102_v0  ;;  %105 = vst [vmem:[%s87_s5 + $0x8] sm:$0xff] (!%p567_p7), %v104_v1 }
  0x14 PF: > { %p570_p8 = scmp.ge.s32.totalorder %s723_s15, 1  ;;  %p110_p9 = scmp.lt.s32.totalorder %s723_s15, 3 }
  0x16   : > { %p111_p10 = pnand %p570_p8, %p110_p9 }
  0x18   : > { %114 = sbr.rel (%p111_p10) target bundleno = 450 (0x1c2), region = 39 }
  0x1f   : > { %s117_s6 = sand.u32 1, %s776_s16   ;;  %s132_s7 = sand.u32 1, %s715_s13   ;;  %v154_v2 = vlaneseq  ;;  %v733_v6 = vmov 0  }
  0x20   : > { %s571_s8 = sshll.u32 %s117_s6, 4  ;;  %s815_s9 = sshll.u32 %s132_s7, 1 }
  0x21   : > { %v818_v3 = vshrl.u32 %v154_v2, 7  ;;  %s119_s10 = scalar_lea.vmem [#allocation0], %s571_s8  ;;  %s820_s11 = scalar_lea.vmem [#allocation1], %s571_s8 }
  0x22   : > { %v143_v4 = vld [vmem:[%s119_s10] sm:$0xff]  ;;  %v575_v5 = vld [vmem:[%s119_s10 + $0x8] sm:$0xff]  ;;  %s149_s17 = sand.u32 7, %s776_s16   ;;  %s134_s20 = scalar_lea.vmem [#allocation3], %s815_s9 }
  0x23   : > { %144 = vst [vmem:[%s820_s11] sm:$0xff] %v143_v4  ;;  %576 = vst [vmem:[%s820_s11 + $0x8] sm:$0xff] %v575_v5  ;;  %s825_s19 = scalar_lea.vmem [#allocation2], %s149_s17  ;;  %s140_s21 = scalar_lea.vmem [#allocation6], %s815_s9 }
  0x24   : > { %153 = vst [vmem:[%s825_s19] sm:$0x1] %v733_v6  ;;  %s830_s22 = scalar_lea.vmem [#allocation5], %s149_s17  ;;  %s725_s26 = smov 0  }
  0x25 LB: >> { %s577_s27 = sshll.u32 %s727_s26, 3  ;;  %s162_s26 = sadd.s32 1, %s727_s26   ;;  %s727_s26 = sphi %s725_s26, %s162_s26  }
  0x26   : >> { %v166_v7 = vstv %s577_s27  ;;  %s164_s28 = scalar_lea.vmem [#allocation7], %s577_s27  ;;  %p159_p11 = scmp.ge.s32.totalorder %s162_s26, 2  }
  0x27   : >> { %v167_v8 = vadd.s32 %v166_v7, %v818_v3  ;;  %s833_s29 = smov (%p159_p11), 0  }
  0x28   : > { %161 = sbr.rel (!%p159_p11) target bundleno = 37 (0x25), region = 191 }
  0x29   : >> { %168 = vst [vmem:[%s164_s28] sm:$0xff] %v167_v8 }
  0x2f LB: >> { %v179_v9 = vld [vmem:[%s820_s11] sm:$0xff]  ;;  %v580_v10 = vld [vmem:[%s820_s11 + $0x8] sm:$0xff]  ;;  %v841_v11 = vadd.s32 8, %v818_v3  ;;  %v844_v13 = vstv %s731_s29  ;;  %s237_s30 = ssub.s32 128, %s731_s29  ;;  %v243_v46 = vand.u32 127, %v154_v2  ;;  %s249_s4 = scalar_lea.vmem %s820_s11, %s731_s29 [#allocation1]  ;;  %s731_s29 = sphi %s833_s29, %s174_s29  }
  0x30   : >> { %v180_v12 = vand.u32 2147483647, %v179_v9  ;;  %v192_v14 = vand.u32 2147483647, %v580_v10  ;;  %vm183_vm1 = vcmp.ge.s32.totalorder %v818_v3, %v844_v13  ;;  %v246_v49 = vld [vmem:[%s825_s19] ss:$0 sm:$0xff] }
  0x31   : >> { %vm196_vm0 = vcmp.lt.s32.totalorder %v841_v11, 11  ;;  %vm195_vm3 = vcmp.ge.s32.totalorder %v841_v11, %v844_v13  ;;  %vm267_vm15 = vcmp.gt.s32.totalorder %v243_v46, %v844_v13  ;;  %v251_v50 = vld [vmem:[%s249_s4] ss:$0 sm:$0xff]  ;;  %s255_s6 = scalar_lea.vmem [#allocation7], %s731_s29  ;;  %s174_s29 = sadd.s32 1, %s731_s29  }
  0x32   : >> { %vm579_vm2 = vcmp.gt.f32.partialorder %v180_v12, -inf  ;;  %vm197_vm5 = vmand %vm195_vm3, %vm196_vm0  ;;  %vm290_vm0 = vcmp.gt.s32.totalorder %v841_v11, %v844_v13  ;;  %v257_v51 = vld [vmem:[%s255_s6] ss:$0 sm:$0xff]  ;;  %p171_p12 = scmp.ge.s32.totalorder %s174_s29, 11  }
  0x33   : >> { %vm187_vm4 = vmand %vm183_vm1, %vm579_vm2  ;;  %vm244_vm1 = vcmp.eq.s32.totalorder %v243_v46, %v844_v13  ;;  %s400_s17 = sshrl.u32 (%p171_p12), %s776_s16, 3  ;;  %s586_s26 = sshll.u32 (%p171_p12), %s776_s16, 4 }
  0x34   : >> { %v188_v15 = vsel %vm187_vm4, %v818_v3, %v844_v13  ;;  %v189_v16 = vsel %vm187_vm4, %v180_v12, -inf  ;;  %vm865_vm2 = vmand %vm290_vm0, %vm244_vm1  ;;  %vm275_vm4 = vcmp.gt.s32.totalorder %v818_v3, %v844_v13  ;;  %s587_s27 = sshll.u32 (%p171_p12), %s400_s17, 5  ;;  %s377_s29 = scalar_lea.vmem (%p171_p12), %s965_s1, %s586_s26 }
  0x35   : >> { %vm198_vm6 = vcmp.lt.f32.partialorder %v189_v16, %v192_v14  ;;  %s734_s26 = smov (%p171_p12), [#allocation3]  }
  0x36   : >> { %vm199_vm7 = vmand %vm197_vm5, %vm198_vm6 }
  0x37   : >> { %v200_v17 = vsel %vm199_vm7, %v841_v11, %v188_v15  ;;  %v201_v18 = vsel %vm199_vm7, %v192_v14, %v189_v16  ;;  %vm279_vm6 = vmand %vm275_vm4, %vm244_vm1 }
  0x38   : >> { %v202_v19 = vrot.slane %v201_v18, 1  ;;  %v203_v20 = vrot.slane %v200_v17, 1 }
  0x3a   : >> { %vm204_vm8 = vcmp.ge.f32.partialorder %v202_v19, %v201_v18  ;;  %v207_v21 = vrot.slane %v202_v19, 1  ;;  %v208_v22 = vrot.slane %v203_v20, 1 }
  0x3b   : >> { %v205_v23 = vsel %vm204_vm8, %v202_v19, %v201_v18  ;;  %v206_v24 = vsel %vm204_vm8, %v203_v20, %v200_v17 }
  0x3c   : >> { %vm209_vm9 = vcmp.ge.f32.partialorder %v207_v21, %v205_v23  ;;  %v212_v25 = vrot.slane %v207_v21, 1  ;;  %v213_v26 = vrot.slane %v208_v22, 1 }
  0x3d   : >> { %v210_v27 = vsel %vm209_vm9, %v207_v21, %v205_v23  ;;  %v211_v28 = vsel %vm209_vm9, %v208_v22, %v206_v24 }
  0x3e   : >> { %vm214_vm10 = vcmp.ge.f32.partialorder %v212_v25, %v210_v27  ;;  %v217_v29 = vrot.slane %v212_v25, 1  ;;  %v218_v30 = vrot.slane %v213_v26, 1 }
  0x3f   : >> { %v215_v31 = vsel %vm214_vm10, %v212_v25, %v210_v27  ;;  %v216_v32 = vsel %vm214_vm10, %v213_v26, %v211_v28 }
  0x40   : >> { %vm219_vm11 = vcmp.ge.f32.partialorder %v217_v29, %v215_v31  ;;  %v222_v33 = vrot.slane %v217_v29, 1  ;;  %v223_v34 = vrot.slane %v218_v30, 1 }
  0x41   : >> { %v220_v35 = vsel %vm219_vm11, %v217_v29, %v215_v31  ;;  %v221_v36 = vsel %vm219_vm11, %v218_v30, %v216_v32 }
  0x42   : >> { %vm224_vm12 = vcmp.ge.f32.partialorder %v222_v33, %v220_v35  ;;  %v227_v37 = vrot.slane %v222_v33, 1  ;;  %v228_v38 = vrot.slane %v223_v34, 1 }
  0x43   : >> { %v225_v39 = vsel %vm224_vm12, %v222_v33, %v220_v35  ;;  %v226_v40 = vsel %vm224_vm12, %v223_v34, %v221_v36 }
  0x44   : >> { %vm229_vm13 = vcmp.ge.f32.partialorder %v227_v37, %v225_v39  ;;  %v232_v41 = vrot.slane %v227_v37, 1  ;;  %v233_v42 = vrot.slane %v228_v38, 1 }
  0x45   : >> { %v230_v43 = vsel %vm229_vm13, %v227_v37, %v225_v39  ;;  %v231_v44 = vsel %vm229_vm13, %v228_v38, %v226_v40 }
  0x46   : >> { %vm234_vm14 = vcmp.ge.f32.partialorder %v232_v41, %v230_v43 }
  0x47   : >> { %v236_v45 = vsel %vm234_vm14, %v233_v42, %v231_v44 }
  0x48   : >> { %238 = vrot.lane.b32.xlu0 %v236_v45, %s237_s30 }
  0xba   : >> { %v239_v48 = vpop.permute.xlu0 %238 }
  0xbb   : >> { %591 = vpush %v239_v48 }
  0xec   : >> { %s592_s5 = spop %591 }
  0xed   : >> { %v245_v52 = vstv %s592_s5  ;;  %s250_s8 = scalar_lea.vmem %s820_s11, %s592_s5 [#allocation1]  ;;  %s256_s10 = scalar_lea.vmem [#allocation7], %s592_s5 }
  0xee   : >> { %v247_v53 = vsel %vm244_vm1, %v245_v52, %v246_v49  ;;  %v252_v54 = vld [vmem:[%s250_s8] ss:$0 sm:$0xff]  ;;  %s911_s5 = scalar_lea.hbm (%p171_p12), %s966_s2, %s587_s27 }
  0xef   : >> { %v258_v55 = vld [vmem:[%s256_s10] ss:$0 sm:$0xff]  ;;  %248 = vst [vmem:[%s825_s19] sm:$0x1] %v247_v53  ;;  %253 = vst [vmem:[%s250_s8] sm:$0x1] %v251_v50  ;;  %vm261_vm3 = vcmp.ne.f32.partialorder %v252_v54, 0.0  ;;  %v268_v5 = vsel %vm267_vm15, %v252_v54, 0.0 }
  0xf0   : >> { %259 = vst [vmem:[%s256_s10] sm:$0x1] %v257_v51  ;;  %254 = vst [vmem:[%s249_s4] sm:$0x1] %v252_v54  ;;  %s368_s8 = scalar_lea.sflag (%p171_p12), [#allocation4], %s132_s7  ;;  %s657_s19 = sshll.u32 (%p171_p12), %s734_s26, 4  ;;  %s658_s19 = int_to_ptr.vmem [resolvable:$false] %s657_s19 }
  0xf1   : >> { %260 = vst [vmem:[%s255_s6] sm:$0x1] %v258_v55  ;;  %vm262_vm5 = vmand %vm244_vm1, %vm261_vm3  ;;  %s407_s6 = sshll.u32 (%p171_p12), %s134_s20, 4  ;;  %s408_s6 = int_to_ptr.vmem [resolvable:$true] %s407_s6 }
  0xf2   : >> { %v263_v56 = vsel %vm262_vm5, %v252_v54, 1.0  ;;  %s653_s10 = scalar_lea.vmem (%p171_p12), %s408_s6, 32  ;;  %p660_p2 = scmp.lt.s32.totalorder (%p171_p12), %s408_s6, %s658_s19 }
  0xf3   : >> { %v291_v57 = vsel %vm290_vm0, %v263_v56, 1.0  ;;  %v276_v58 = vsel %vm275_vm4, %v263_v56, 1.0  ;;  %p654_p13 = scmp.ne.s32.totalorder (%p171_p12), %s408_s6, %s653_s10 }
  0xf4   : >> { %649 = vrcp.f32 %v291_v57 }
  0xf5   : >> { %651 = vrcp.f32 %v276_v58  ;;  %p655_p0 = pnand (%p171_p12), %p654_p13, %p793_p5 }
  0xf6   : > { %v354_v14 = vld [vmem:[#allocation2] sm:$0x3] (%p171_p12) }
  0xf7   : >> { %v581_v60 = vld [vmem:[%s820_s11 + $0x8] sm:$0xff]  ;;  %v272_v63 = vld [vmem:[%s820_s11] sm:$0xff]  ;;  %356 = vst [vmem:[%s134_s20] sm:$0x3] (%p171_p12), %v354_v14  ;;  %p656_p1 = pneg (%p171_p12), %p655_p0 }
  0xf8   : > { %v301_v12 = vld [vmem:[#allocation7] sm:$0xff] (%p171_p12)  ;;  %v303_v13 = vld [vmem:[#allocation7 + $0x8] sm:$0xff] (%p171_p12) }
  0xfe   : >> { %v650_v59 = vpop.eup %649 }
  0xff   : >> { %v652_v61 = vpop.eup %651  ;;  %v293_v62 = vmul.f32 %v650_v59, %v581_v60 }
 0x100   : >> { %v278_v0 = vmul.f32 %v652_v61, %v272_v63 }
 0x101   : >> { %v295_v1 = vsel %vm865_vm2, %v293_v62, 0.0 }
 0x102   : >> { %296 = vadd.xlane.f32.xlu1 %v295_v1  ;;  %v280_v4 = vsel %vm279_vm6, %v278_v0, 0.0 }
 0x103   : >> { %281 = vadd.xlane.f32.xlu0 %v280_v4 }
 0x130   : > { %318 = vxpose.xlu0.b32.start [1/2] (short) (narrow) (%p171_p12), %v301_v12, 8 }
 0x134   : > { %319 = vxpose.xlu0.b32.end [2/2] (short) (narrow) (%p171_p12), %v303_v13, 8 }
 0x18f   : >> { %v297_v6 = vpop.xlane.xlu1 %296  ;;  %173 = sbr.rel (!%p171_p12) target bundleno = 47 (0x2f), region = 202 }
 0x190   : >> { %v298_v7 = vmul.f32 %v297_v6, %v268_v5  ;;  %v282_v8 = vpop.xlane.xlu0 %281 }
 0x191   : >> { %v283_v9 = vmul.f32 %v282_v8, %v268_v5 }
 0x192   : >> { %v299_v10 = vsub.f32 %v293_v62, %v298_v7 }
 0x193   : >> { %v284_v11 = vsub.f32 %v278_v0, %v283_v9 }
 0x194   : >> { %582 = vst [vmem:[%s820_s11 + $0x8] sm:$0xff] %v299_v10 }
 0x195   : >> { %285 = vst [vmem:[%s820_s11] sm:$0xff] %v284_v11 }
 0x19b   : > { %v392_v3 = vld [vmem:[%s820_s11 + $0x8] sm:$0xff] }
 0x19c   : > { %v390_v2 = vld [vmem:[%s820_s11] sm:$0xff]  ;;  %393 = vst [vmem:[%s377_s29 + $0x8] sm:$0xff] %v392_v3  ;;  %s659_s11 = scalar_lea.vmem %s658_s19, 64 }
 0x19d   : > { %391 = vst [vmem:[%s377_s29] sm:$0xff] %v390_v2  ;;  %p661_p3 = scmp.lt.s32.totalorder %s659_s11, %s653_s10 }
 0x19f   : > { %p662_p4 = por %p661_p3, %p660_p2 }
 0x1a1   : > { %p663_p8 = pnand %p662_p4, %p656_p1 }
 0x1a3   : > { %666 = shalt.err (!%p663_p8)
}
 0x1a4   : > { %s667_s7 = scalar_lea.hbm %s911_s5, 32  ;;  %s671_s28 = scalar_lea.hbm %s966_s2, 32 }
 0x1a5   : > { %p668_p9 = scmp.ne.s32.totalorder %s911_s5, %s667_s7  ;;  %p672_p12 = scmp.lt.u32.totalorder %s911_s5, %s966_s2 }
 0x1a6   : > { %p673_p13 = scmp.lt.u32.totalorder %s671_s28, %s667_s7  ;;  %p675_p1 = scmp.lt.u32.totalorder %s667_s7, %s911_s5 }
 0x1a7   : > { %p669_p10 = pnand %p668_p9, %p793_p5 }
 0x1a8   : > { %p674_p0 = por %p673_p13, %p672_p12 }
 0x1a9   : > { %p670_p11 = pneg %p669_p10 }
 0x1aa   : > { %p676_p2 = por %p675_p1, %p674_p0 }
 0x1ac   : > { %p677_p3 = pnand %p676_p2, %p670_p11 }
 0x1ae   : > { %680 = shalt.err (!%p677_p3)
}
 0x1af   : > { %593 = dma.vmem_to_hbm [thread:$0]  (%p793_p5), %s408_s6, 32, %s911_s5, %s368_s8  }
 0x1b0   : > { %v334_v15 = vpop.trf.xlu0  ;;  %s588_s4 = sshll.u32 (%p793_p5), %s400_s17, 1 }
 0x1b1   : > { %350 = vst [vmem:[%s830_s22] sm:$0x1] %v334_v15  ;;  %s416_s19 = scalar_lea.vmem (%p793_p5), %s967_s3, %s588_s4 }
 0x1b3   : > { %413 = sbr.rel (!%p793_p5) target bundleno = 450 (0x1c2), region = 80 }
 0x1b8   : > { %v360_v16 = vld [vmem:[#allocation5] sm:$0x3] }
 0x1b9   : > { %362 = vst [vmem:[%s140_s21] sm:$0x3] %v360_v16 }
 0x1c0   : > { %v432_v17 = vld [vmem:[%s140_s21] sm:$0x3] }
 0x1c1   : > { %433 = vst [vmem:[%s416_s19] sm:$0x3] %v432_v17 }
 0x1c2 PF: > { %s460_s22 = sand.u32 1, %s711_s12   ;;  %p596_p5 = pnand %p567_p7, %p797_p6 }
 0x1c3   : > { %s461_s24 = scalar_lea.sflag [#allocation4], %s460_s22 }
 0x1c4   : > { %706 = dma.done.wait (!%p596_p5), %s461_s24, 32  }
 0x1c5   : > { %708 = vsyncadd (!%p596_p5), %s461_s24, 4294967264  ;;  %p10_p4 = scmp.ge.s32.totalorder %s780_s18, 4   ;;  %s972_s12 = smov %s715_s13 }
 0x1c6   : > { %s973_s13 = smov %s719_s14  ;;  %s974_s14 = smov %s791_s23 }
 0x1c7   : > { %s975_s15 = smov %s780_s18  ;;  %12 = sbr.rel (!%p10_p4) target bundleno = 3 (0x3), region = 213 }
 0x1ce   :  { %473 = vsyncpa [#allocation4], 1 }
 0x1cf   :  { %475 = vsyncpa [#allocation4 + $0x1], 1 }

// kernel: custom-call.10
= control target key start
LH: loop header
LB: loop body
LE: loop exit
PB: predicated region body
PF: predicated region fallthrough
CT: control target
= control target key end

     0   :  { %s482_s6 = smov 0   ;;  %s484_s7 = smov 0   ;;  %s558_s0 = inlined_call_operand.vmem [shape: f32[2,1,11,11], index: 0, kind: input, shape index: {}]   ;;  %s559_s1 = inlined_call_operand.vmem [shape: f32[2,1,11,11], index: 1, kind: output, shape index: {}]  }
   0x1   :  { %s486_s8 = smov 0  }
   0x2 LB: > { %s398_s9 = sadd.s32 4294967295, %s468_s8   ;;  %s33_s10 = sadd.s32 1, %s464_s7  ;;  %s468_s8 = sphi %s486_s8, %s7_s8   ;;  %s464_s7 = sphi %s484_s7, %s561_s7   ;;  %s460_s6 = sphi %s482_s6, %s560_s6  }
   0x3   : > { %p35_p0 = scmp.ge.s32.totalorder %s33_s10, 2  ;;  %p400_p1 = scmp.ge.s32.totalorder %s468_s8, 2 }
   0x4   : > { %s49_s11 = sand.u32 (!%p400_p1), 1, %s468_s8   ;;  %s414_s12 = sshll.u32 (!%p400_p1), %s464_s7, 4 }
   0x5   : > { %s563_s10 = smov (%p35_p0, %s33_s10), 0  ;;  %47 = sbr.rel (%p400_p1) target bundleno = 12 (0xc), region = 16 }
   0x6   : > { %s401_s13 = sshll.u32 (!%p400_p1), %s49_s11, 4  ;;  %s58_s16 = scalar_lea.vmem (!%p400_p1), %s558_s0, %s414_s12 }
   0x7   : > { %v88_v0 = vld [vmem:[%s58_s16] sm:$0xff] (!%p400_p1)  ;;  %v90_v1 = vld [vmem:[%s58_s16 + $0x8] sm:$0xff] (!%p400_p1)  ;;  %s51_s17 = scalar_lea.vmem (!%p400_p1), [#allocation0], %s401_s13 }
   0x8   : > { %89 = vst [vmem:[%s51_s17] sm:$0xff] (!%p400_p1), %v88_v0  ;;  %91 = vst [vmem:[%s51_s17 + $0x8] sm:$0xff] (!%p400_p1), %v90_v1 }
   0xc PF: > { %p404_p2 = scmp.ge.s32.totalorder %s468_s8, 1  ;;  %p96_p3 = scmp.lt.s32.totalorder %s468_s8, 3 }
   0xe   : > { %p97_p4 = pnand %p404_p2, %p96_p3 }
  0x10   : > { %100 = sbr.rel (%p97_p4) target bundleno = 1648 (0x670), region = 54 }
  0x17   : > { %s103_s18 = sand.u32 1, %s398_s9   ;;  %v114_v2 = vlaneseq  ;;  %v470_v11 = vmov -1.0   ;;  %v471_v55 = vmov 0.0   ;;  %s415_s21 = sshll.u32 %s460_s6, 4 }
  0x18   : > { %s405_s19 = sshll.u32 %s103_s18, 4  ;;  %s298_s24 = scalar_lea.vmem %s559_s1, %s415_s21 }
  0x19   : > { %v509_v3 = vand.u32 127, %v114_v2  ;;  %v118_v4 = vshrl.u32 %v114_v2, 7  ;;  %s511_s20 = scalar_lea.vmem [#allocation0], %s405_s19 }
  0x1a   : > { %v121_v5 = vld [vmem:[%s511_s20] sm:$0xff]  ;;  %v407_v38 = vld [vmem:[%s511_s20 + $0x8] sm:$0xff] }
  0x1b   : > { %vm120_vm0 = vcmp.eq.s32.totalorder %v118_v4, %v509_v3  ;;  %vm116_vm1 = vcmp.lt.s32.totalorder %v509_v3, 11  ;;  %vm125_vm2 = vcmp.ge.s32.totalorder %v118_v4, %v509_v3  ;;  %vm155_vm4 = vcmp.eq.s32.totalorder %v509_v3, 0 }
  0x1c   : > { %v122_v6 = vsel %vm120_vm0, %v121_v5, 0.0  ;;  %vm126_vm3 = vmand %vm125_vm2, %vm116_vm1  ;;  %vm152_vm5 = vcmp.eq.s32.totalorder %v509_v3, %v118_v4  ;;  %v156_v12 = vsel %vm155_vm4, 1.0, %v470_v11  ;;  %vm170_vm6 = vcmp.eq.s32.totalorder %v509_v3, 1 }
  0x1d   : > { %123 = vadd.xlane.f32.xlu0 %v122_v6  ;;  %v127_v8 = vsel %vm126_vm3, %v121_v5, 0.0  ;;  %v157_v13 = vsel %vm152_vm5, %v156_v12, 0.0  ;;  %vm180_vm7 = vcmp.eq.s32.totalorder %v509_v3, 2  ;;  %vm190_vm8 = vcmp.eq.s32.totalorder %v509_v3, 3 }
  0x1e   : > { %vm200_vm9 = vcmp.eq.s32.totalorder %v509_v3, 4  ;;  %v135_v33 = vadd.s32 8, %v118_v4  ;;  %vm210_vm11 = vcmp.eq.s32.totalorder %v509_v3, 5  ;;  %vm220_vm14 = vcmp.eq.s32.totalorder %v509_v3, 6 }
  0x1f   : > { %vm230_vm0 = vcmp.eq.s32.totalorder %v509_v3, 7  ;;  %vm254_vm2 = vcmp.eq.s32.totalorder %v509_v3, 9  ;;  %vm268_vm3 = vcmp.eq.s32.totalorder %v509_v3, 10 }
  0x20   : > { %vm136_vm10 = vcmp.eq.s32.totalorder %v135_v33, %v509_v3  ;;  %vm141_vm12 = vcmp.ge.s32.totalorder %v135_v33, %v509_v3  ;;  %vm163_vm15 = vcmp.eq.s32.totalorder %v509_v3, %v135_v33 }
  0x21   : > { %v138_v39 = vsel %vm136_vm10, %v407_v38, 0.0  ;;  %vm142_vm13 = vmand %vm141_vm12, %vm116_vm1  ;;  %v164_v56 = vsel %vm163_vm15, -1.0, %v471_v55  ;;  %vm240_vm1 = vcmp.eq.s32.totalorder %v509_v3, 8 }
  0x22   : > { %v143_v46 = vsel %vm142_vm13, %v407_v38, 0.0 }
  0xaa   : > { %v515_v7 = vpop.xlane.xlu0 %123 }
  0xab   : > { %442 = vrcp.f32 %v515_v7  ;;  %vm279_vm5 = vweird.f32 %v515_v7 }
  0xb5   : > { %v522_v9 = vpop.eup %442 }
  0xb6   : > { %v129_v10 = vmul.f32 %v522_v9, %v127_v8 }
  0xb8   : > { %130 = vst [vmem:[#allocation2] sm:$0xff] %v129_v10 }
  0xbf   : > { %v166_v14 = vld [vmem:[#allocation2 + $0x1] ss:$0 sm:$0xff]  ;;  %v176_v17 = vld [vmem:[#allocation2 + $0x2] ss:$0 sm:$0xff]  ;;  %v186_v22 = vld [vmem:[#allocation2 + $0x3] ss:$0 sm:$0xff] }
  0xc0   : > { %v167_v15 = vxor.u32 2147483648, %v166_v14  ;;  %v177_v19 = vxor.u32 2147483648, %v176_v17  ;;  %v187_v24 = vxor.u32 2147483648, %v186_v22  ;;  %v196_v27 = vld [vmem:[#allocation2 + $0x4] ss:$0 sm:$0xff] }
  0xc1   : > { %v197_v29 = vxor.u32 2147483648, %v196_v27  ;;  %v206_v32 = vld [vmem:[#allocation2 + $0x5] ss:$0 sm:$0xff]  ;;  %v216_v40 = vld [vmem:[#allocation2 + $0x6] ss:$0 sm:$0xff] }
  0xc2   : > { %v171_v16 = vmul.f32 %v167_v15, %v157_v13  ;;  %v207_v35 = vxor.u32 2147483648, %v206_v32  ;;  %v217_v42 = vxor.u32 2147483648, %v216_v40  ;;  %v226_v49 = vld [vmem:[#allocation2 + $0x7] ss:$0 sm:$0xff] }
  0xc3   : > { %v227_v52 = vxor.u32 2147483648, %v226_v49 }
  0xc4   : > { %172 = vadd.xlane.f32.xlu0 %v171_v16 }
 0x151   : > { %v173_v18 = vpop.xlane.xlu0 %172 }
 0x152   : > { %v174_v20 = vsel %vm170_vm6, %v173_v18, %v157_v13 }
 0x153   : > { %v181_v21 = vmul.f32 %v177_v19, %v174_v20 }
 0x155   : > { %182 = vadd.xlane.f32.xlu1 %v181_v21 }
 0x1e2   : > { %v183_v23 = vpop.xlane.xlu1 %182 }
 0x1e3   : > { %v184_v25 = vsel %vm180_vm7, %v183_v23, %v174_v20 }
 0x1e4   : > { %v191_v26 = vmul.f32 %v187_v24, %v184_v25 }
 0x1e6   : > { %192 = vadd.xlane.f32.xlu1 %v191_v26 }
 0x273   : > { %v193_v28 = vpop.xlane.xlu1 %192 }
 0x274   : > { %v194_v30 = vsel %vm190_vm8, %v193_v28, %v184_v25 }
 0x275   : > { %v201_v31 = vmul.f32 %v197_v29, %v194_v30 }
 0x277   : > { %202 = vadd.xlane.f32.xlu0 %v201_v31 }
 0x304   : > { %v203_v34 = vpop.xlane.xlu0 %202 }
 0x305   : > { %v204_v36 = vsel %vm200_vm9, %v203_v34, %v194_v30 }
 0x306   : > { %v211_v37 = vmul.f32 %v207_v35, %v204_v36 }
 0x308   : > { %212 = vadd.xlane.f32.xlu1 %v211_v37 }
 0x30c   : > { %139 = vadd.xlane.f32.xlu1 %v138_v39 }
 0x395   : > { %v213_v41 = vpop.xlane.xlu1 %212 }
 0x396   : > { %v214_v43 = vsel %vm210_vm11, %v213_v41, %v204_v36 }
 0x397   : > { %v221_v44 = vmul.f32 %v217_v42, %v214_v43 }
 0x399   : > { %222 = vadd.xlane.f32.xlu0 %v221_v44  ;;  %v140_v45 = vpop.xlane.xlu1 %139 }
 0x39a   : > { %444 = vrcp.f32 %v140_v45  ;;  %vm284_vm4 = vweird.f32 %v140_v45 }
 0x3a4   : > { %v445_v47 = vpop.eup %444 }
 0x3a5   : > { %v145_v48 = vmul.f32 %v445_v47, %v143_v46 }
 0x3a7   : > { %146 = vst [vmem:[#allocation2 + $0x8] sm:$0xff] %v145_v48 }
 0x3ae   : > { %v236_v50 = vld [vmem:[#allocation2 + $0x8] ss:$0 sm:$0xff]  ;;  %v250_v61 = vld [vmem:[#allocation2 + $0x9] ss:$0 sm:$0xff]  ;;  %v264_v6 = vld [vmem:[#allocation2 + $0xa] ss:$0 sm:$0xff] }
 0x3af   : > { %v237_v53 = vxor.u32 2147483648, %v236_v50  ;;  %v251_v0 = vxor.u32 2147483648, %v250_v61  ;;  %v265_v11 = vxor.u32 2147483648, %v264_v6 }
 0x3b1   : > { %v245_v58 = vmul.f32 %v237_v53, %v164_v56 }
 0x426   : > { %v223_v51 = vpop.xlane.xlu0 %222 }
 0x427   : > { %v224_v54 = vsel %vm220_vm14, %v223_v51, %v214_v43 }
 0x428   : > { %v231_v57 = vmul.f32 %v227_v52, %v224_v54 }
 0x42a   : > { %232 = vadd.xlane.f32.xlu0 %v231_v57 }
 0x42e   : > { %246 = vadd.xlane.f32.xlu0 %v245_v58 }
 0x4b7   : > { %v233_v59 = vpop.xlane.xlu0 %232 }
 0x4b8   : > { %v234_v60 = vsel %vm230_vm0, %v233_v59, %v224_v54 }
 0x4b9   : > { %v241_v62 = vmul.f32 %v237_v53, %v234_v60 }
 0x4bb   : > { %v247_v63 = vpop.xlane.xlu0 %246  ;;  %242 = vadd.xlane.f32.xlu1 %v241_v62 }
 0x4bc   : > { %v248_v1 = vsel %vm240_vm1, %v247_v63, %v164_v56 }
 0x4bd   : > { %v259_v2 = vmul.f32 %v251_v0, %v248_v1 }
 0x4bf   : > { %260 = vadd.xlane.f32.xlu0 %v259_v2 }
 0x548   : > { %v243_v4 = vpop.xlane.xlu1 %242 }
 0x549   : > { %v244_v5 = vsel %vm240_vm1, %v243_v4, %v234_v60 }
 0x54a   : > { %v255_v8 = vmul.f32 %v251_v0, %v244_v5 }
 0x54c   : > { %v261_v10 = vpop.xlane.xlu0 %260  ;;  %256 = vadd.xlane.f32.xlu1 %v255_v8 }
 0x54d   : > { %v262_v12 = vsel %vm254_vm2, %v261_v10, %v248_v1 }
 0x54e   : > { %v273_v13 = vmul.f32 %v265_v11, %v262_v12 }
 0x550   : > { %274 = vadd.xlane.f32.xlu0 %v273_v13 }
 0x5d9   : > { %v257_v14 = vpop.xlane.xlu1 %256 }
 0x5da   : > { %v258_v15 = vsel %vm254_vm2, %v257_v14, %v244_v5 }
 0x5db   : > { %v269_v16 = vmul.f32 %v265_v11, %v258_v15 }
 0x5dd   : > { %v275_v17 = vpop.xlane.xlu0 %274  ;;  %270 = vadd.xlane.f32.xlu1 %v269_v16 }
 0x5de   : > { %v276_v18 = vsel %vm268_vm3, %v275_v17, %v262_v12 }
 0x5df   : > { %v283_v19 = vmul.f32 %v445_v47, %v276_v18 }
 0x5e1   : > { %v285_v20 = vsel %vm284_vm4, %v276_v18, %v283_v19 }
 0x5e2   : > { %331 = vst [vmem:[%s298_s24 + $0x8] sm:$0xff] %v285_v20 }
 0x66a   : > { %v271_v21 = vpop.xlane.xlu1 %270 }
 0x66b   : > { %v272_v22 = vsel %vm268_vm3, %v271_v21, %v258_v15 }
 0x66c   : > { %v278_v23 = vmul.f32 %v522_v9, %v272_v22 }
 0x66e   : > { %v280_v3 = vsel %vm279_vm5, %v272_v22, %v278_v23 }
 0x66f   : > { %329 = vst [vmem:[%s298_s24] sm:$0xff] %v280_v3 }
 0x670 PF: > { %s7_s8 = sadd.s32 1, %s468_s8   ;;  %s560_s6 = smov %s464_s7 }
 0x671   : > { %p4_p5 = scmp.ge.s32.totalorder %s7_s8, 4   ;;  %s561_s7 = smov %s563_s10 }
 0x673   :  { %6 = sbr.rel (!%p4_p5) target bundleno = 2 (0x2), region = 131 }

// kernel: custom-call.9
= control target key start
LH: loop header
LB: loop body
LE: loop exit
PB: predicated region body
PF: predicated region fallthrough
CT: control target
= control target key end

     0   :  { %s501_s6 = smov 0   ;;  %s503_s7 = smov 0   ;;  %s609_s0 = inlined_call_operand.vmem [shape: f32[2,1,11,11], index: 0, kind: input, shape index: {}]   ;;  %s610_s1 = inlined_call_operand.vmem [shape: f32[2,1,11,11], index: 1, kind: output, shape index: {}]  }
   0x1   :  { %s505_s8 = smov 0  }
   0x2 LB: > { %s417_s9 = sadd.s32 4294967295, %s487_s8   ;;  %s33_s10 = sadd.s32 1, %s483_s7  ;;  %s487_s8 = sphi %s505_s8, %s7_s8   ;;  %s483_s7 = sphi %s503_s7, %s612_s7   ;;  %s479_s6 = sphi %s501_s6, %s611_s6  }
   0x3   : > { %p35_p0 = scmp.ge.s32.totalorder %s33_s10, 2  ;;  %p419_p1 = scmp.ge.s32.totalorder %s487_s8, 2 }
   0x4   : > { %s49_s11 = sand.u32 (!%p419_p1), 1, %s487_s8   ;;  %s433_s12 = sshll.u32 (!%p419_p1), %s483_s7, 4 }
   0x5   : > { %s614_s10 = smov (%p35_p0, %s33_s10), 0  ;;  %47 = sbr.rel (%p419_p1) target bundleno = 12 (0xc), region = 16 }
   0x6   : > { %s420_s13 = sshll.u32 (!%p419_p1), %s49_s11, 4  ;;  %s58_s16 = scalar_lea.vmem (!%p419_p1), %s609_s0, %s433_s12 }
   0x7   : > { %v88_v0 = vld [vmem:[%s58_s16] sm:$0xff] (!%p419_p1)  ;;  %v90_v1 = vld [vmem:[%s58_s16 + $0x8] sm:$0xff] (!%p419_p1)  ;;  %s51_s17 = scalar_lea.vmem (!%p419_p1), [#allocation0], %s420_s13 }
   0x8   : > { %89 = vst [vmem:[%s51_s17] sm:$0xff] (!%p419_p1), %v88_v0  ;;  %91 = vst [vmem:[%s51_s17 + $0x8] sm:$0xff] (!%p419_p1), %v90_v1 }
   0xc PF: > { %p423_p2 = scmp.ge.s32.totalorder %s487_s8, 1  ;;  %p96_p3 = scmp.lt.s32.totalorder %s487_s8, 3 }
   0xe   : > { %p97_p4 = pnand %p423_p2, %p96_p3 }
  0x10   : > { %100 = sbr.rel (%p97_p4) target bundleno = 1650 (0x672), region = 54 }
  0x17   : > { %s103_s18 = sand.u32 1, %s417_s9   ;;  %v114_v2 = vlaneseq  ;;  %v489_v18 = vmov -1.0   ;;  %v490_v25 = vmov 0.0   ;;  %s434_s21 = sshll.u32 %s479_s6, 4 }
  0x18   : > { %s424_s19 = sshll.u32 %s103_s18, 4  ;;  %s317_s24 = scalar_lea.vmem %s610_s1, %s434_s21 }
  0x19   : > { %v528_v3 = vand.u32 127, %v114_v2  ;;  %v118_v4 = vshrl.u32 %v114_v2, 7  ;;  %s105_s20 = scalar_lea.vmem [#allocation0], %s424_s19 }
  0x1a   : > { %v121_v5 = vld [vmem:[%s105_s20] sm:$0xff]  ;;  %v426_v7 = vld [vmem:[%s105_s20 + $0x8] sm:$0xff] }
  0x1b   : > { %vm116_vm0 = vcmp.lt.s32.totalorder %v528_v3, 11  ;;  %v135_v6 = vadd.s32 8, %v118_v4  ;;  %vm120_vm1 = vcmp.eq.s32.totalorder %v118_v4, %v528_v3  ;;  %vm125_vm2 = vcmp.le.s32.totalorder %v118_v4, %v528_v3 }
  0x1c   : > { %v122_v8 = vsel %vm120_vm1, %v121_v5, 0.0  ;;  %vm126_vm3 = vmand %vm125_vm2, %vm116_vm0  ;;  %vm162_vm7 = vcmp.eq.s32.totalorder %v528_v3, 10  ;;  %vm152_vm9 = vcmp.eq.s32.totalorder %v528_v3, %v118_v4  ;;  %vm170_vm10 = vcmp.eq.s32.totalorder %v528_v3, 9 }
  0x1d   : > { %vm136_vm4 = vcmp.eq.s32.totalorder %v135_v6, %v528_v3  ;;  %vm141_vm5 = vcmp.le.s32.totalorder %v135_v6, %v528_v3  ;;  %v127_v9 = vsel %vm126_vm3, %v121_v5, 0.0  ;;  %123 = vadd.xlane.f32.xlu1 %v122_v8  ;;  %vm159_vm8 = vcmp.eq.s32.totalorder %v528_v3, %v135_v6 }
  0x1e   : > { %v138_v10 = vsel %vm136_vm4, %v426_v7, 0.0  ;;  %vm142_vm6 = vmand %vm141_vm5, %vm116_vm0  ;;  %v163_v19 = vsel %vm162_vm7, 1.0, %v489_v18  ;;  %v153_v26 = vsel %vm152_vm9, -1.0, %v490_v25  ;;  %vm190_vm11 = vcmp.eq.s32.totalorder %v528_v3, 7 }
  0x1f   : > { %v143_v11 = vsel %vm142_vm6, %v426_v7, 0.0  ;;  %139 = vadd.xlane.f32.xlu0 %v138_v10  ;;  %v164_v21 = vsel %vm159_vm8, %v163_v19, 0.0  ;;  %vm180_vm12 = vcmp.eq.s32.totalorder %v528_v3, 8  ;;  %vm204_vm13 = vcmp.eq.s32.totalorder %v528_v3, 6 }
  0x20   : > { %vm218_vm14 = vcmp.eq.s32.totalorder %v528_v3, 5  ;;  %vm232_vm15 = vcmp.eq.s32.totalorder %v528_v3, 4  ;;  %vm246_vm0 = vcmp.eq.s32.totalorder %v528_v3, 3  ;;  %vm260_vm1 = vcmp.eq.s32.totalorder %v528_v3, 2 }
  0x21   : > { %vm274_vm2 = vcmp.eq.s32.totalorder %v528_v3, 1  ;;  %vm287_vm3 = vcmp.eq.s32.totalorder %v528_v3, 0 }
  0xaa   : > { %v535_v12 = vpop.xlane.xlu1 %123 }
  0xab   : > { %461 = vrcp.f32 %v535_v12  ;;  %vm298_vm4 = vweird.f32 %v535_v12 }
  0xac   : > { %v538_v13 = vpop.xlane.xlu0 %139 }
  0xad   : > { %463 = vrcp.f32 %v538_v13  ;;  %vm303_vm5 = vweird.f32 %v538_v13 }
  0xb5   : > { %v541_v14 = vpop.eup %461 }
  0xb6   : > { %v129_v15 = vmul.f32 %v541_v14, %v127_v9 }
  0xb7   : > { %v544_v16 = vpop.eup %463 }
  0xb8   : > { %v145_v17 = vmul.f32 %v544_v16, %v143_v11  ;;  %130 = vst [vmem:[#allocation2] sm:$0xff] %v129_v15 }
  0xba   : > { %146 = vst [vmem:[#allocation2 + $0x8] sm:$0xff] %v145_v17 }
  0xbf   : > { %v186_v20 = vld [vmem:[#allocation2 + $0x7] ss:$0 sm:$0xff]  ;;  %v200_v30 = vld [vmem:[#allocation2 + $0x6] ss:$0 sm:$0xff]  ;;  %v214_v41 = vld [vmem:[#allocation2 + $0x5] ss:$0 sm:$0xff] }
  0xc0   : > { %v187_v24 = vxor.u32 2147483648, %v186_v20  ;;  %v201_v35 = vxor.u32 2147483648, %v200_v30  ;;  %v215_v44 = vxor.u32 2147483648, %v214_v41  ;;  %v228_v49 = vld [vmem:[#allocation2 + $0x4] ss:$0 sm:$0xff] }
  0xc1   : > { %v166_v22 = vld [vmem:[#allocation2 + $0x9] ss:$0 sm:$0xff]  ;;  %v176_v29 = vld [vmem:[#allocation2 + $0x8] ss:$0 sm:$0xff]  ;;  %v229_v52 = vxor.u32 2147483648, %v228_v49 }
  0xc2   : > { %v167_v23 = vxor.u32 2147483648, %v166_v22  ;;  %v191_v28 = vmul.f32 %v187_v24, %v153_v26  ;;  %v177_v32 = vxor.u32 2147483648, %v176_v29  ;;  %v242_v57 = vld [vmem:[#allocation2 + $0x3] ss:$0 sm:$0xff]  ;;  %v256_v1 = vld [vmem:[#allocation2 + $0x2] ss:$0 sm:$0xff] }
  0xc3   : > { %v243_v60 = vxor.u32 2147483648, %v242_v57  ;;  %v257_v5 = vxor.u32 2147483648, %v256_v1  ;;  %v270_v10 = vld [vmem:[#allocation2 + $0x1] ss:$0 sm:$0xff]  ;;  %v283_v22 = vld [vmem:[#allocation2] ss:$0 sm:$0xff] }
  0xc4   : > { %v171_v27 = vmul.f32 %v167_v23, %v164_v21  ;;  %v271_v17 = vxor.u32 2147483648, %v270_v10  ;;  %v284_v25 = vxor.u32 2147483648, %v283_v22 }
  0xc6   : > { %172 = vadd.xlane.f32.xlu0 %v171_v27 }
  0xca   : > { %192 = vadd.xlane.f32.xlu0 %v191_v28 }
 0x153   : > { %v173_v31 = vpop.xlane.xlu0 %172 }
 0x154   : > { %v174_v33 = vsel %vm170_vm10, %v173_v31, %v164_v21 }
 0x155   : > { %v181_v34 = vmul.f32 %v177_v32, %v174_v33 }
 0x157   : > { %182 = vadd.xlane.f32.xlu1 %v181_v34  ;;  %v193_v36 = vpop.xlane.xlu0 %192 }
 0x158   : > { %v194_v37 = vsel %vm190_vm11, %v193_v36, %v153_v26 }
 0x159   : > { %v205_v38 = vmul.f32 %v201_v35, %v194_v37 }
 0x15b   : > { %206 = vadd.xlane.f32.xlu0 %v205_v38 }
 0x1e4   : > { %v183_v39 = vpop.xlane.xlu1 %182 }
 0x1e5   : > { %v184_v40 = vsel %vm180_vm12, %v183_v39, %v174_v33 }
 0x1e6   : > { %v195_v42 = vmul.f32 %v187_v24, %v184_v40 }
 0x1e8   : > { %v207_v43 = vpop.xlane.xlu0 %206  ;;  %196 = vadd.xlane.f32.xlu1 %v195_v42 }
 0x1e9   : > { %v208_v45 = vsel %vm204_vm13, %v207_v43, %v194_v37 }
 0x1ea   : > { %v219_v46 = vmul.f32 %v215_v44, %v208_v45 }
 0x1ec   : > { %220 = vadd.xlane.f32.xlu0 %v219_v46 }
 0x275   : > { %v197_v47 = vpop.xlane.xlu1 %196 }
 0x276   : > { %v198_v48 = vsel %vm190_vm11, %v197_v47, %v184_v40 }
 0x277   : > { %v209_v50 = vmul.f32 %v201_v35, %v198_v48 }
 0x279   : > { %v221_v51 = vpop.xlane.xlu0 %220  ;;  %210 = vadd.xlane.f32.xlu1 %v209_v50 }
 0x27a   : > { %v222_v53 = vsel %vm218_vm14, %v221_v51, %v208_v45 }
 0x27b   : > { %v233_v54 = vmul.f32 %v229_v52, %v222_v53 }
 0x27d   : > { %234 = vadd.xlane.f32.xlu0 %v233_v54 }
 0x306   : > { %v211_v55 = vpop.xlane.xlu1 %210 }
 0x307   : > { %v212_v56 = vsel %vm204_vm13, %v211_v55, %v198_v48 }
 0x308   : > { %v223_v58 = vmul.f32 %v215_v44, %v212_v56 }
 0x30a   : > { %v235_v59 = vpop.xlane.xlu0 %234  ;;  %224 = vadd.xlane.f32.xlu1 %v223_v58 }
 0x30b   : > { %v236_v61 = vsel %vm232_vm15, %v235_v59, %v222_v53 }
 0x30c   : > { %v247_v62 = vmul.f32 %v243_v60, %v236_v61 }
 0x30e   : > { %248 = vadd.xlane.f32.xlu0 %v247_v62 }
 0x397   : > { %v225_v63 = vpop.xlane.xlu1 %224 }
 0x398   : > { %v226_v0 = vsel %vm218_vm14, %v225_v63, %v212_v56 }
 0x399   : > { %v237_v2 = vmul.f32 %v229_v52, %v226_v0 }
 0x39b   : > { %v249_v4 = vpop.xlane.xlu0 %248  ;;  %238 = vadd.xlane.f32.xlu1 %v237_v2 }
 0x39c   : > { %v250_v6 = vsel %vm246_vm0, %v249_v4, %v236_v61 }
 0x39d   : > { %v261_v7 = vmul.f32 %v257_v5, %v250_v6 }
 0x39f   : > { %262 = vadd.xlane.f32.xlu0 %v261_v7 }
 0x428   : > { %v239_v8 = vpop.xlane.xlu1 %238 }
 0x429   : > { %v240_v9 = vsel %vm232_vm15, %v239_v8, %v226_v0 }
 0x42a   : > { %v251_v11 = vmul.f32 %v243_v60, %v240_v9 }
 0x42c   : > { %v263_v15 = vpop.xlane.xlu0 %262  ;;  %252 = vadd.xlane.f32.xlu1 %v251_v11 }
 0x42d   : > { %v264_v18 = vsel %vm260_vm1, %v263_v15, %v250_v6 }
 0x42e   : > { %v275_v19 = vmul.f32 %v271_v17, %v264_v18 }
 0x430   : > { %276 = vadd.xlane.f32.xlu0 %v275_v19 }
 0x4b9   : > { %v253_v20 = vpop.xlane.xlu1 %252 }
 0x4ba   : > { %v254_v21 = vsel %vm246_vm0, %v253_v20, %v240_v9 }
 0x4bb   : > { %v265_v23 = vmul.f32 %v257_v5, %v254_v21 }
 0x4bd   : > { %v277_v24 = vpop.xlane.xlu0 %276  ;;  %266 = vadd.xlane.f32.xlu1 %v265_v23 }
 0x4be   : > { %v278_v26 = vsel %vm274_vm2, %v277_v24, %v264_v18 }
 0x4bf   : > { %v288_v27 = vmul.f32 %v284_v25, %v278_v26 }
 0x4c1   : > { %289 = vadd.xlane.f32.xlu0 %v288_v27 }
 0x54a   : > { %v267_v28 = vpop.xlane.xlu1 %266 }
 0x54b   : > { %v268_v29 = vsel %vm260_vm1, %v267_v28, %v254_v21 }
 0x54c   : > { %v279_v30 = vmul.f32 %v271_v17, %v268_v29 }
 0x54e   : > { %v290_v31 = vpop.xlane.xlu0 %289  ;;  %280 = vadd.xlane.f32.xlu1 %v279_v30 }
 0x54f   : > { %v291_v32 = vsel %vm287_vm3, %v290_v31, %v278_v26 }
 0x550   : > { %v297_v33 = vmul.f32 %v541_v14, %v291_v32 }
 0x552   : > { %v299_v34 = vsel %vm298_vm4, %v291_v32, %v297_v33 }
 0x553   : > { %348 = vst [vmem:[%s317_s24] sm:$0xff] %v299_v34 }
 0x5db   : > { %v281_v35 = vpop.xlane.xlu1 %280 }
 0x5dc   : > { %v282_v36 = vsel %vm274_vm2, %v281_v35, %v268_v29 }
 0x5dd   : > { %v292_v37 = vmul.f32 %v284_v25, %v282_v36 }
 0x5df   : > { %293 = vadd.xlane.f32.xlu1 %v292_v37 }
 0x66c   : > { %v294_v38 = vpop.xlane.xlu1 %293 }
 0x66d   : > { %v295_v39 = vsel %vm287_vm3, %v294_v38, %v282_v36 }
 0x66e   : > { %v302_v40 = vmul.f32 %v544_v16, %v295_v39 }
 0x670   : > { %v304_v41 = vsel %vm303_vm5, %v295_v39, %v302_v40 }
 0x671   : > { %350 = vst [vmem:[%s317_s24 + $0x8] sm:$0xff] %v304_v41 }
 0x672 PF: > { %s7_s8 = sadd.s32 1, %s487_s8   ;;  %s611_s6 = smov %s483_s7 }
 0x673   : > { %p4_p5 = scmp.ge.s32.totalorder %s7_s8, 4   ;;  %s612_s7 = smov %s614_s10 }
 0x675   :  { %6 = sbr.rel (!%p4_p5) target bundleno = 2 (0x2), region = 130 }

// kernel: tps_coeffs.1
= control target key start
LH: loop header
LB: loop body
LE: loop exit
PB: predicated region body
PF: predicated region fallthrough
CT: control target
= control target key end

     0   :  { %s250_s6 = smov 0   ;;  %s269_s0 = inlined_call_operand.vmem [shape: f32[2,2,8], index: 0, kind: input, shape index: {}]   ;;  %s270_s1 = inlined_call_operand.vmem [shape: f32[2,11,11], index: 1, kind: output, shape index: {}]  }
   0x1 LB: > { %s211_s7 = sadd.s32 4294967295, %s238_s6   ;;  %p215_p0 = scmp.ge.s32.totalorder %s238_s6, 1  ;;  %s238_s6 = sphi %s250_s6, %s11_s6  }
   0x2   : > { %p86_p1 = scmp.lt.s32.totalorder %s238_s6, 3 }
   0x4   : > { %p87_p2 = pnand %p215_p0, %p86_p1 }
   0x5   : > { %p105_p3 = scmp.lt.s32.totalorder (!%p87_p2), %s211_s7, 1  ;;  %v115_v0 = vlaneseq (!%p87_p2)  ;;  %vm147_vm0 = vcmask (!%p87_p2), 1040384   ;;  %vm149_vm1 = vcmask (!%p87_p2), 1041408   ;;  %vm154_vm2 = vcmask (!%p87_p2), 83968  }
   0x6   : > { %90 = sbr.rel (%p87_p2) target bundleno = 165 (0xa5), region = 24  ;;  %vm138_vm3 = vcmask (!%p87_p2), 64512   ;;  %vm140_vm4 = vcmask (!%p87_p2), 72704   ;;  %vm142_vm5 = vcmask (!%p87_p2), 80896   ;;  %vm152_vm6 = vcmask (!%p87_p2), 89088  }
   0x7   : > { %v116_v1 = vshrl.u32 (!%p87_p2), %v115_v0, 7 }
   0x9   : > { %v117_v2 = vsub.s32 (!%p87_p2), 0, %v116_v1  ;;  %v125_v3 = vsub.s32 (!%p87_p2), 1, %v116_v1 }
   0xd   : > { %s272_s7 = smov (!%p105_p3, %s211_s7), 1 }
   0xe   : > { %s216_s8 = sshll.u32 %s272_s7, 1  ;;  %s221_s12 = sshll.u32 %s272_s7, 4 }
   0xf   : > { %s108_s11 = scalar_lea.vmem %s269_s0, %s216_s8  ;;  %s113_s15 = scalar_lea.vmem %s270_s1, %s221_s12 }
  0x10   : > { %v114_v4 = vld [vmem:[%s108_s11] sm:$0x3] }
  0x11   : > { %v118_v5 = vrot.slane %v114_v4, %v117_v2  ;;  %v145_v6 = vrot.slane %v114_v4, 7  ;;  %v126_v8 = vrot.slane %v114_v4, %v125_v3 }
  0x13   : > { %v148_v7 = vsel %vm147_vm0, 1.0, %v145_v6  ;;  %120 = vbcast.lane.b32.xlu0 %v118_v5, 256 }
  0x14   : > { %v150_v9 = vsel %vm149_vm1, %v148_v7, %v145_v6 }
  0x15   : > { %v151_v10 = vsel %vm138_vm3, %v150_v9, 0.0 }
  0x16   : > { %155 = vst.msk [vmem:[%s113_s15 + $0x8] sm:$0x7] %vm154_vm2, %v151_v10 }
  0x17   : > { %128 = vbcast.lane.b32.xlu0 %v126_v8, 256 }
  0x85   : > { %v121_v11 = vpop.permute.xlu0 %120 }
  0x86   : > { %v122_v12 = vsub.f32 %v121_v11, %v118_v5 }
  0x88   : > { %v131_v15 = vmul.f32 %v122_v12, %v122_v12 }
  0x89   : > { %v129_v13 = vpop.permute.xlu0 %128 }
  0x8a   : > { %v130_v14 = vsub.f32 %v129_v13, %v126_v8 }
  0x8c   : > { %v132_v16 = vmul.f32 %v130_v14, %v130_v14 }
  0x8e   : > { %v133_v17 = vadd.f32 %v132_v16, %v131_v15 }
  0x90   : > { %v134_v18 = vadd.f32 1e-09, %v133_v17 }
  0x92   : > { %230 = vlog2.f32 %v134_v18 }
  0x9c   : > { %v231_v19 = vpop.eup %230 }
  0x9d   : > { %v136_v20 = vmul.f32 0.6931472, %v231_v19 }
  0x9f   : > { %v137_v21 = vmul.f32 %v136_v20, %v133_v17 }
  0xa1   : > { %v139_v22 = vsel %vm138_vm3, %v137_v21, 1.0 }
  0xa2   : > { %v141_v23 = vsel %vm140_vm4, %v139_v22, %v121_v11 }
  0xa3   : > { %v143_v24 = vsel %vm142_vm5, %v141_v23, %v129_v13 }
  0xa4   : > { %153 = vst.msk [vmem:[%s113_s15] sm:$0xff] %vm152_vm6, %v143_v24 }
  0xa5 PF: > { %s11_s6 = sadd.s32 1, %s238_s6  }
  0xa6   : > { %p8_p4 = scmp.ge.s32.totalorder %s11_s6, 4  }
  0xa8   :  { %10 = sbr.rel (!%p8_p4) target bundleno = 1 (0x1), region = 54 }

</bundles_post_ra>
